<compile_context>
chip_gen: v7x
topology: tpu7x:2x2x1
jax: 0.10.0
libtpu: 0.0.40
codegen_flags: <defaults>
</compile_context>

<pallas_src>
import functools

import jax
import jax.numpy as jnp
from jax.experimental import pallas as pl
from jax.experimental.pallas import tpu as pltpu


def _round_up(x, m):
    return (x + m - 1) // m * m


# -----------------------------------------------------------------------------
# Pallas kernel: the entire MLP stack for one row tile.
# refs = (x_ref, [w, shift] * num_layers, o_ref)
# -----------------------------------------------------------------------------
def _mlp_kernel(*refs, num_layers):
    x_ref, o_ref = refs[0], refs[-1]
    h = x_ref[...].astype(jnp.bfloat16)                   # (tm, F) -> bf16 MXU operand
    for l in range(num_layers):
        w_ref, s_ref = refs[1 + 2 * l: 3 + 2 * l]
        # Linear with BN scale pre-folded into w (MXU, f32 accumulate),
        # then folded bias+BN shift, then ReLU.
        y = jnp.dot(h, w_ref[...], preferred_element_type=jnp.float32)
        y = jnp.maximum(y + s_ref[...], 0.0)
        h = y.astype(jnp.bfloat16) if l + 1 < num_layers else y
    o_ref[...] = h.astype(o_ref.dtype)                    # bf16 store


# -----------------------------------------------------------------------------
# Parameter prep (run ONCE, outside jit): BN fold + lane padding + bf16 cast.
# -----------------------------------------------------------------------------
def prepare_mlp_params(layers, eps=1e-5):
    """layers: list of (w, b, gamma, beta, mean, var) -> list of (w_folded, shift)."""
    prepared = []
    pk = layers[0][0].shape[0]                            # first K stays unpadded (= F)
    for (w, b, gamma, beta, mean, var) in layers:
        din, dout = w.shape
        pn = _round_up(dout, 128)                         # lane-dense output channels
        scale = gamma / jnp.sqrt(var + eps)               # eval-mode BN fold
        shift = beta - mean * scale
        w_f = (w * scale[None, :]).astype(jnp.bfloat16)   # fold scale, then cast
        s_f = b * scale + shift                           # folded bias + BN shift (f32)
        # Padded channels get zero weight columns and zero shift -> stay exactly 0.
        w_p = jnp.zeros((pk, pn), jnp.bfloat16).at[:din, :dout].set(w_f)
        s_p = jnp.zeros((1, pn), jnp.float32).at[0, :dout].set(s_f)
        prepared.append((w_p, s_p))
        pk = pn
    return prepared


# -----------------------------------------------------------------------------
# Tiling / VMEM budgeting
# -----------------------------------------------------------------------------
def _vmem_budget_bytes():
    try:
        phys = pltpu.get_tpu_info().vmem_capacity_bytes
    except Exception:
        phys = 64 * 1024 * 1024                           # conservative (v7x per-core)
    return min(phys * 3 // 4, 64 * 1024 * 1024)


def _pick_tm(M, fdim, prepared, vmem_budget):
    max_pn = max(w.shape[1] for (w, _) in prepared)
    out_pn = prepared[-1][0].shape[1]
    # Weights/shifts (double-buffered by the pipeline, tiny anyway).
    w_bytes = 2 * sum(w.size * 2 + s.size * 4 for (w, s) in prepared)
    for tm in (2048, 1024, 512, 256):                     # MXU-height aligned
        need = (2 * tm * fdim * 4                         # f32 input, double-buffered
                + 2 * tm * out_pn * 2                     # bf16 output, double-buffered
                + w_bytes
                + 2 * tm * max_pn * 4)                    # live f32 activations
        if tm < M and need <= vmem_budget:                # keep row grid >= 2 steps
            return tm
    # Small M (single grid step): one tile covering all rows, sublane aligned.
    return _round_up(M, 16) if M >= 16 else _round_up(M, 8)


# -----------------------------------------------------------------------------
# Forward wrapper
# -----------------------------------------------------------------------------
def mlp_pallas_forward(x, prepared):
    """x: (bs, num_frames, F); prepared: output of prepare_mlp_params."""
    bs, nf, fdim = x.shape
    M = bs * nf
    h = x.reshape(M, fdim)                                # free reshape, no copy

    num_layers = len(prepared)
    out_pn = prepared[-1][0].shape[1]                     # 256 (module asserts this)

    vmem_budget = _vmem_budget_bytes()
    tm = _pick_tm(M, fdim, prepared, vmem_budget)
    grid = pl.cdiv(M, tm)                                 # tail block masked by Pallas

    args = [h]
    in_specs = [pl.BlockSpec((tm, fdim), lambda i: (i, 0))]
    for (w_p, s_p) in prepared:
        pk, pn = w_p.shape
        args += [w_p, s_p]
        in_specs += [
            pl.BlockSpec((pk, pn), lambda i: (0, 0)),     # folded weight, VMEM-resident
            pl.BlockSpec((1, pn), lambda i: (0, 0)),      # folded bias/BN shift
        ]

    flops = 2 * M * sum(w.shape[0] * w.shape[1] for (w, _) in prepared)
    bytes_accessed = (M * fdim * 4
                      + sum(w.size * 2 + s.size * 4 for (w, s) in prepared)
                      + M * out_pn * 2)

    kernel = functools.partial(_mlp_kernel, num_layers=num_layers)
    out = pl.pallas_call(
        kernel,
        out_shape=jax.ShapeDtypeStruct((M, out_pn), jnp.bfloat16),
        grid_spec=pltpu.PrefetchScalarGridSpec(
            num_scalar_prefetch=0,
            grid=(grid,),
            in_specs=in_specs,
            out_specs=pl.BlockSpec((tm, out_pn), lambda i: (i, 0)),
        ),
        compiler_params=pltpu.CompilerParams(
            dimension_semantics=("parallel",),
            vmem_limit_bytes=int(vmem_budget),
        ),
        cost_estimate=pl.CostEstimate(
            flops=int(flops), transcendentals=0, bytes_accessed=int(bytes_accessed)),
    )(*args)

    # hidden_units[-1] == 256 is already lane-dense, so no feature slice in practice.
    # (Guarded at trace time; a no-op for this module.)
    return out.reshape(bs, nf, out_pn)


# -----------------------------------------------------------------------------
# Parameter construction (deterministic, synthetic) + pure-JAX reference
# -----------------------------------------------------------------------------
def init_mlp_params(key, hidden_units):
    assert len(hidden_units) - 1 > 0
    assert hidden_units[-1] == 256                        # mirrors the module's assert
    layers = []
    din = hidden_units[0]
    for dout in hidden_units[1:]:
        key, k1, k2, k3, k4, k5, k6 = jax.random.split(key, 7)
        w = jax.random.normal(k1, (din, dout), jnp.float32) / jnp.sqrt(din)
        b = 0.01 * jax.random.normal(k2, (dout,), jnp.float32)
        gamma = 1.0 + 0.1 * jax.random.normal(k3, (dout,), jnp.float32)
        beta = 0.1 * jax.random.normal(k4, (dout,), jnp.float32)
        mean = 0.1 * jax.random.normal(k5, (dout,), jnp.float32)
        var = 1.0 + 0.1 * jnp.abs(jax.random.normal(k6, (dout,), jnp.float32))
        layers.append((w, b, gamma, beta, mean, var))
        din = dout
    return layers


def mlp_reference(x, layers, eps=1e-5):
    """Pure-JAX f32 reference (eval mode: Dropout identity, BN running stats)."""
    bs, nf, fd = x.shape
    h = x.reshape(bs * nf, fd)
    for (w, b, gamma, beta, mean, var) in layers:
        z = h @ w + b
        z = (z - mean) * (gamma / jnp.sqrt(var + eps)) + beta
        h = jnp.maximum(z, 0.0)
    return h.reshape(bs, nf, -1)


# -----------------------------------------------------------------------------
if __name__ == "__main__":
    # Small shapes consistent with the module (hidden_units[-1] must be 256).
    bs, num_frames = 2, 8
    hidden_units = [64, 32, 256]

    key = jax.random.PRNGKey(0)
    kx, kp = jax.random.split(key)
    x = jax.random.normal(kx, (bs, num_frames, hidden_units[0]), jnp.float32)
    layers = init_mlp_params(kp, hidden_units)

    # TODO(synk): training-mode Dropout / batch-stat BatchNorm not implemented (eval mode only).
    prepared = prepare_mlp_params(layers)                 # once, outside jit
    fwd = jax.jit(mlp_pallas_forward)
    out = jax.block_until_ready(fwd(x, prepared))

    assert out.shape == (bs, num_frames, hidden_units[-1]), out.shape
    out32 = out.astype(jnp.float32)
    assert bool(jnp.all(jnp.isfinite(out32)))

    ref = mlp_reference(x, layers)
    abs_err = jnp.abs(out32 - ref)
    tol = 0.2 + 0.05 * jnp.abs(ref)                       # mixed abs/rel tolerance (bf16 path)
    max_err = float(jnp.max(abs_err))
    assert bool(jnp.all(abs_err <= tol)), f"max abs error vs reference: {max_err}"
    print("KERNEL_OK")
</pallas_src>

<mosaic_0001>
module attributes {stable_mosaic.version = 11 : i64} {
  func.func @_mlp_kernel(%arg0: i32, %arg1: memref<16x64xf32, #tpu.memory_space<vmem>>, %arg2: memref<64x128xbf16, #tpu.memory_space<vmem>>, %arg3: memref<1x128xf32, #tpu.memory_space<vmem>>, %arg4: memref<128x256xbf16, #tpu.memory_space<vmem>>, %arg5: memref<1x256xf32, #tpu.memory_space<vmem>>, %arg6: memref<16x256xbf16, #tpu.memory_space<vmem>>) attributes {dimension_semantics = [#tpu.dimension_semantics<parallel>], iteration_bounds = array<i64: 1>, scalar_prefetch = 0 : i64, scratch_operands = 0 : i64, tpu.core_type = #tpu.core_type<tc>, window_params = [{transform_indices = @transform_0, window_bounds = array<i64: 16, 64>}, {pipeline_mode = #tpu.pipeline_mode<synchronous>, transform_indices = @transform_1, window_bounds = array<i64: 64, 128>}, {pipeline_mode = #tpu.pipeline_mode<synchronous>, transform_indices = @transform_2, window_bounds = array<i64: 1, 128>}, {pipeline_mode = #tpu.pipeline_mode<synchronous>, transform_indices = @transform_3, window_bounds = array<i64: 128, 256>}, {pipeline_mode = #tpu.pipeline_mode<synchronous>, transform_indices = @transform_4, window_bounds = array<i64: 1, 256>}, {transform_indices = @transform_5, window_bounds = array<i64: 16, 256>}]} {
    %c0 = arith.constant 0 : index
    %c0_0 = arith.constant 0 : index
    %0 = vector.load %arg1[%c0, %c0_0] : memref<16x64xf32, #tpu.memory_space<vmem>>, vector<16x64xf32>
    %1 = arith.truncf %0 : vector<16x64xf32> to vector<16x64xbf16>
    %c0_1 = arith.constant 0 : index
    %c0_2 = arith.constant 0 : index
    %2 = vector.load %arg2[%c0_1, %c0_2] : memref<64x128xbf16, #tpu.memory_space<vmem>>, vector<64x128xbf16>
    %cst = arith.constant dense<0.000000e+00> : vector<16x128xf32>
    %3 = tpu.matmul %1, %2, %cst {dimension_numbers = #tpu.dot_dimension_numbers<[1], [0], [0], [1], [0, 0, 1, 1], [], []>} : vector<16x64xbf16>, vector<64x128xbf16>, vector<16x128xf32> -> vector<16x128xf32>
    %c0_3 = arith.constant 0 : index
    %c0_4 = arith.constant 0 : index
    %4 = vector.load %arg3[%c0_3, %c0_4] : memref<1x128xf32, #tpu.memory_space<vmem>>, vector<1x128xf32>
    %5 = vector.broadcast %4 : vector<1x128xf32> to vector<16x128xf32>
    %6 = arith.addf %3, %5 : vector<16x128xf32>
    %cst_5 = arith.constant 0.000000e+00 : f32
    %7 = vector.broadcast %cst_5 : f32 to vector<16x128xf32>
    %8 = arith.maximumf %6, %7 : vector<16x128xf32>
    %9 = arith.truncf %8 : vector<16x128xf32> to vector<16x128xbf16>
    %c0_6 = arith.constant 0 : index
    %c0_7 = arith.constant 0 : index
    %10 = vector.load %arg4[%c0_6, %c0_7] : memref<128x256xbf16, #tpu.memory_space<vmem>>, vector<128x256xbf16>
    %cst_8 = arith.constant dense<0.000000e+00> : vector<16x256xf32>
    %11 = tpu.matmul %9, %10, %cst_8 {dimension_numbers = #tpu.dot_dimension_numbers<[1], [0], [0], [1], [0, 0, 1, 1], [], []>} : vector<16x128xbf16>, vector<128x256xbf16>, vector<16x256xf32> -> vector<16x256xf32>
    %c0_9 = arith.constant 0 : index
    %c0_10 = arith.constant 0 : index
    %12 = vector.load %arg5[%c0_9, %c0_10] : memref<1x256xf32, #tpu.memory_space<vmem>>, vector<1x256xf32>
    %13 = vector.broadcast %12 : vector<1x256xf32> to vector<16x256xf32>
    %14 = arith.addf %11, %13 : vector<16x256xf32>
    %cst_11 = arith.constant 0.000000e+00 : f32
    %15 = vector.broadcast %cst_11 : f32 to vector<16x256xf32>
    %16 = arith.maximumf %14, %15 : vector<16x256xf32>
    %17 = arith.truncf %16 : vector<16x256xf32> to vector<16x256xbf16>
    %c0_12 = arith.constant 0 : index
    %c0_13 = arith.constant 0 : index
    %18 = vector.load %arg6[%c0_12, %c0_13] : memref<16x256xbf16, #tpu.memory_space<vmem>>, vector<16x256xbf16>
    tpu.vector_store %arg6[%c0_12, %c0_13], %17 {strides = array<i32>} : memref<16x256xbf16, #tpu.memory_space<vmem>>, vector<16x256xbf16>,
    return
  }
  func.func @transform_0(%arg0: i32) -> (i32, i32) {
    %c0_i32 = arith.constant 0 : i32
    %c0_i32_0 = arith.constant 0 : i32
    return %arg0, %c0_i32 : i32, i32
  }
  func.func @transform_1(%arg0: i32) -> (i32, i32) {
    %c0_i32 = arith.constant 0 : i32
    %c0_i32_0 = arith.constant 0 : i32
    %c0_i32_1 = arith.constant 0 : i32
    return %c0_i32, %c0_i32_0 : i32, i32
  }
  func.func @transform_2(%arg0: i32) -> (i32, i32) {
    %c0_i32 = arith.constant 0 : i32
    %c0_i32_0 = arith.constant 0 : i32
    %c0_i32_1 = arith.constant 0 : i32
    return %c0_i32, %c0_i32_0 : i32, i32
  }
  func.func @transform_3(%arg0: i32) -> (i32, i32) {
    %c0_i32 = arith.constant 0 : i32
    %c0_i32_0 = arith.constant 0 : i32
    %c0_i32_1 = arith.constant 0 : i32
    return %c0_i32, %c0_i32_0 : i32, i32
  }
  func.func @transform_4(%arg0: i32) -> (i32, i32) {
    %c0_i32 = arith.constant 0 : i32
    %c0_i32_0 = arith.constant 0 : i32
    %c0_i32_1 = arith.constant 0 : i32
    return %c0_i32, %c0_i32_0 : i32, i32
  }
  func.func @transform_5(%arg0: i32) -> (i32, i32) {
    %c0_i32 = arith.constant 0 : i32
    %c0_i32_0 = arith.constant 0 : i32
    return %arg0, %c0_i32 : i32, i32
  }
}

</mosaic_0001>

<bundles_post_ra>
// kernel: mlp_pallas_forward.1
= control target key start
LH: loop header
LB: loop body
LE: loop exit
PB: predicated region body
PF: predicated region fallthrough
CT: control target
= control target key end

     0   :  { %10 = vsyncpa [#allocation3], 0  ;;  %s620_s0 = inlined_call_operand.hbm [shape: f32[16,64], index: 0, kind: input, shape index: {}]   ;;  %s621_s1 = inlined_call_operand.hbm [shape: bf16[64,128], index: 1, kind: input, shape index: {}]   ;;  %s622_s2 = inlined_call_operand.vmem [shape: f32[1,128], index: 2, kind: input, shape index: {}]   ;;  %s623_s3 = inlined_call_operand.hbm [shape: bf16[128,256], index: 3, kind: input, shape index: {}]   ;;  %s624_s4 = inlined_call_operand.vmem [shape: f32[1,256], index: 4, kind: input, shape index: {}]   ;;  %s625_s5 = inlined_call_operand.hbm [shape: bf16[16,256], index: 5, kind: output, shape index: {}]  }
   0x1   :  { %11 = vsyncpa [#allocation6], 0 }
   0x2   :  { %12 = vsyncpa [#allocation4], 0  ;;  %s516_s18 = smov [#allocation5]   ;;  %s422_s22 = scalar_lea.hbm %s621_s1, 512 }
   0x3   :  { %s30_s19 = sshll.u32 %s516_s18, 4  ;;  %p423_p0 = scmp.ne.s32.totalorder %s621_s1, %s422_s22  ;;  %s31_s19 = int_to_ptr.vmem [resolvable:$true] %s30_s19 }
   0x4   :  { %p426_p1 = scmp.lt.u32.totalorder %s422_s22, %s621_s1 }
   0x6   :  { %p428_p2 = pnand %p426_p1, %p423_p0 }
   0x8   :  { %431 = shalt.err (!%p428_p2)
}
   0x9   :  { %s432_s27 = scalar_lea.vmem %s31_s19, 512  ;;  %p437_p4 = scmp.lt.s32.totalorder %s31_s19, %s31_s19 }
   0xa   :  { %p433_p3 = scmp.ne.s32.totalorder %s31_s19, %s432_s27  ;;  %p438_p5 = scmp.lt.s32.totalorder %s432_s27, %s432_s27 }
   0xc   :  { %p439_p6 = por %p438_p5, %p437_p4 }
   0xe   :  { %p440_p7 = pnand %p439_p6, %p433_p3 }
  0x10   :  { %443 = shalt.err (!%p440_p7)
}
  0x11   :  { %s517_s28 = smov 64   ;;  %s518_s29 = smov 4  }
  0x12   :  { %36 = dma.hbm_to_vmem [thread:$0]  %s621_s1, 512, %s31_s19, [#allocation6], %s517_s28, %s517_s28, %s518_s29  }
  0x13   :  { %s519_s7 = smov [#allocation2]   ;;  %s444_s11 = scalar_lea.hbm %s620_s0, 256 }
  0x14   :  { %s18_s8 = sshll.u32 %s519_s7, 4  ;;  %p445_p8 = scmp.ne.s32.totalorder %s620_s0, %s444_s11  ;;  %s19_s8 = int_to_ptr.vmem [resolvable:$true] %s18_s8 }
  0x15   :  { %p448_p9 = scmp.lt.u32.totalorder %s444_s11, %s620_s0 }
  0x17   :  { %p450_p10 = pnand %p448_p9, %p445_p8 }
  0x19   :  { %453 = shalt.err (!%p450_p10)
}
  0x1a   :  { %s454_s16 = scalar_lea.vmem %s19_s8, 256  ;;  %p459_p12 = scmp.lt.s32.totalorder %s19_s8, %s19_s8 }
  0x1b   :  { %p455_p11 = scmp.ne.s32.totalorder %s19_s8, %s454_s16  ;;  %p460_p13 = scmp.lt.s32.totalorder %s454_s16, %s454_s16 }
  0x1d   :  { %p461_p0 = por %p460_p13, %p459_p12 }
  0x1f   :  { %p462_p1 = pnand %p461_p0, %p455_p11 }
  0x21   :  { %465 = shalt.err (!%p462_p1)
}
  0x22   :  { %s520_s1 = smov 128   ;;  %s521_s17 = smov 8  }
  0x23   :  { %24 = dma.hbm_to_vmem [thread:$0]  %s620_s0, 256, %s19_s8, [#allocation3], %s520_s1, %s520_s1, %s521_s17  }
  0x24   :  { %s522_s20 = smov [#allocation7]   ;;  %s466_s24 = scalar_lea.hbm %s623_s3, 2048 }
  0x25   :  { %s44_s21 = sshll.u32 %s522_s20, 4  ;;  %p467_p2 = scmp.ne.s32.totalorder %s623_s3, %s466_s24  ;;  %s45_s21 = int_to_ptr.vmem [resolvable:$true] %s44_s21 }
  0x26   :  { %p470_p3 = scmp.lt.u32.totalorder %s466_s24, %s623_s3 }
  0x28   :  { %p472_p4 = pnand %p470_p3, %p467_p2 }
  0x2a   :  { %475 = shalt.err (!%p472_p4)
}
  0x2b   :  { %s476_s29 = scalar_lea.vmem %s45_s21, 2048  ;;  %p481_p6 = scmp.lt.s32.totalorder %s45_s21, %s45_s21 }
  0x2c   :  { %p477_p5 = scmp.ne.s32.totalorder %s45_s21, %s476_s29  ;;  %p482_p7 = scmp.lt.s32.totalorder %s476_s29, %s476_s29 }
  0x2e   :  { %p483_p8 = por %p482_p7, %p481_p6 }
  0x30   :  { %p484_p9 = pnand %p483_p8, %p477_p5 }
  0x32   :  { %487 = shalt.err (!%p484_p9)
}
  0x33   :  { %50 = dma.hbm_to_vmem [thread:$0]  %s623_s3, 2048, %s45_s21, [#allocation6], %s520_s1, %s520_s1, %s521_s17  }
  0x34   :  { %510 = dma.done.wait [#allocation3], 256  }
  0x35   :  { %511 = vsyncadd [#allocation3], 4294967040 }
  0x36   :  { %512 = dma.done.wait [#allocation6], 2560  }
  0x37   :  { %513 = vsyncadd [#allocation6], 4294964736  ;;  %v523_v0 = vmov 0.0   ;;  %vm524_vm0 = vmmov 0   ;;  %v394_v1 = vld [vmem:[#allocation5] sm:$0xff]   ;;  %v395_v2 = vld [vmem:[#allocation5 + $0x8] sm:$0xff]   ;;  %v171_v35 = vlaneseq }
  0x38   :  { %371 = vmatprep.subr.bf16.mxu0 %v523_v0  ;;  %379 = vmatprep.mubr.msk.bf16.mxu0 %vm524_vm0, %v523_v0  ;;  %v396_v3 = vld [vmem:[#allocation5 + $0x10] sm:$0xff]   ;;  %v398_v4 = vld [vmem:[#allocation7 + $0x4] ss:$8 sps:$4 sm:$0xff]   ;;  %v400_v5 = vld [vmem:[#allocation7] ss:$8 sps:$4 sm:$0xff]   ;;  %vm105_vm1 = vcmask 523264  }
  0x39   :  { %372 = vmatpush3.bf16.msra.mxu0 %v394_v1  ;;  %v401_v6 = vld [vmem:[#allocation7 + $0x14] ss:$8 sps:$4 sm:$0xff]   ;;  %261 = vmatprep.subr.bf16.mxu1 %v398_v4  ;;  %v403_v8 = vld [vmem:[#allocation7 + $0x10] ss:$8 sps:$4 sm:$0xff]   ;;  %v404_v10 = vld [vmem:[#allocation7 + $0x24] ss:$8 sps:$4 sm:$0xff]  }
  0x3a   :  { %373 = vmatprep.subr.bf16.mxu0 %v523_v0  ;;  %v397_v7 = vld [vmem:[#allocation5 + $0x18] sm:$0xff]   ;;  %262 = vmatpush1.bf16.msra.mxu1 %v400_v5  ;;  %v63_v9 = vld [vmem:[#allocation2] sm:$0xff]  ;;  %v406_v12 = vld [vmem:[#allocation7 + $0x20] ss:$8 sps:$4 sm:$0xff]   ;;  %v525_v24 = vmov 0   ;;  %v172_v36 = vshrl.u32 %v171_v35, 7 }
  0x3b   :  { %263 = vmatprep.subr.bf16.mxu1 %v401_v6  ;;  %v64_v11 = vld [vmem:[#allocation2 + $0x8] sm:$0xff]  ;;  %v410_v16 = vld [vmem:[#allocation7 + $0x44] ss:$8 sps:$4 sm:$0xff]   ;;  %v412_v17 = vld [vmem:[#allocation7 + $0x40] ss:$8 sps:$4 sm:$0xff]   ;;  %293 = vmatprep.mubr.bf16.mxu1 %v525_v24 }
  0x3c   :  { %v407_v13 = vld [vmem:[#allocation7 + $0x34] ss:$8 sps:$4 sm:$0xff]   ;;  %v65_v14 = vpack.c.bf16 %v64_v11, %v63_v9  ;;  %v409_v15 = vld [vmem:[#allocation7 + $0x30] ss:$8 sps:$4 sm:$0xff]   ;;  %v416_v20 = vld [vmem:[#allocation7 + $0x64] ss:$8 sps:$4 sm:$0xff]  }
  0x3d   :  { %374 = vmatpush3.bf16.msra.mxu0 %v395_v2  ;;  %v413_v18 = vld [vmem:[#allocation7 + $0x54] ss:$8 sps:$4 sm:$0xff]   ;;  %v415_v19 = vld [vmem:[#allocation7 + $0x50] ss:$8 sps:$4 sm:$0xff]   ;;  %v418_v21 = vld [vmem:[#allocation7 + $0x60] ss:$8 sps:$4 sm:$0xff]  }
  0x3e   :  { %375 = vmatprep.subr.bf16.mxu0 %v523_v0  ;;  %264 = vmatpush1.bf16.msra.mxu1 %v403_v8  ;;  %v419_v22 = vld [vmem:[#allocation7 + $0x74] ss:$8 sps:$4 sm:$0xff]   ;;  %v421_v23 = vld [vmem:[#allocation7 + $0x70] ss:$8 sps:$4 sm:$0xff]   ;;  %v173_v37 = vsub.s32 0, %v172_v36  ;;  %v177_v39 = vsub.s32 1, %v172_v36 }
  0x3f   :  { %265 = vmatprep.subr.bf16.mxu1 %v404_v10  ;;  %v340_v25 = vld [vmem:[%s622_s2] ss:$0 sm:$0xff]  ;;  %s526_s2 = smov [#allocation8]  }
  0x40   :  { %v169_v38 = vld [vmem:[%s624_s4] sm:$0x3]  ;;  %s327_s9 = sshll.u32 %s526_s2, 4  ;;  %s328_s9 = int_to_ptr.vmem [resolvable:$true] %s327_s9 }
  0x41   :  { %376 = vmatpush3.bf16.msra.mxu0 %v396_v3  ;;  %v174_v40 = vrot.slane %v169_v38, %v173_v37  ;;  %v178_v41 = vrot.slane %v169_v38, %v177_v39  ;;  %s488_s4 = scalar_lea.vmem %s328_s9, 256  ;;  %p493_p11 = scmp.lt.s32.totalorder %s328_s9, %s328_s9 }
  0x42   :  { %377 = vmatprep.subr.bf16.mxu0 %v523_v0  ;;  %266 = vmatpush1.bf16.msra.mxu1 %v406_v12  ;;  %p489_p10 = scmp.ne.s32.totalorder %s328_s9, %s488_s4  ;;  %p494_p12 = scmp.lt.s32.totalorder %s488_s4, %s488_s4 }
  0x43   :  { %267 = vmatprep.subr.bf16.mxu1 %v407_v13 }
  0x44   :  { %p495_p13 = por %p494_p12, %p493_p11 }
  0x45   :  { %378 = vmatpush3.bf16.msra.mxu0 %v397_v7 }
  0x46   :  { %268 = vmatpush1.bf16.msra.mxu1 %v409_v15  ;;  %p496_p0 = pnand %p495_p13, %p489_p10 }
  0x47   :  { %269 = vmatprep.subr.bf16.mxu1 %v410_v16 }
  0x48   :  { %380 = vmatmul.mubr.msk.bf16.vlgmr.msra.gmra.mrb[0].mxu0 %vm105_vm1, %v65_v14 }
  0x4a   :  { %270 = vmatpush1.bf16.msra.mxu1 %v412_v17 }
  0x4b   :  { %271 = vmatprep.subr.bf16.mxu1 %v413_v18 }
  0x4e   :  { %272 = vmatpush1.bf16.msra.mxu1 %v415_v19 }
  0x4f   :  { %273 = vmatprep.subr.bf16.mxu1 %v416_v20 }
  0x52   :  { %274 = vmatpush1.bf16.msra.mxu1 %v418_v21 }
  0x53   :  { %275 = vmatprep.subr.bf16.mxu1 %v419_v22 }
  0x56   :  { %276 = vmatpush1.bf16.msra.mxu1 %v421_v23 }
 0x11b   :  { %v143_v26 = vpop.f32.mrb[0].mxu0 }
 0x11c   :  { %v144_v27 = vadd.f32 %v340_v25, %v143_v26  ;;  %v381_v28 = vpop.f32.mrb[1].mxu0 }
 0x11d   :  { %v146_v29 = vpop.f32.mrb[2].mxu0 }
 0x11e   :  { %v147_v30 = vadd.f32 %v340_v25, %v146_v29  ;;  %v382_v31 = vpop.f32.mrb[3].mxu0  ;;  %v150_v32 = vmax.f32 %v144_v27, 0.0 }
 0x120   :  { %v151_v33 = vmax.f32 %v147_v30, 0.0 }
 0x122   :  { %v152_v34 = vpack.c.bf16 %v151_v33, %v150_v32 }
 0x124   :  { %294 = vmatmul.mubr.bf16.vlgmr.msra.gmra.mrb[0].mxu1 %v152_v34 }
 0x1f7   :  { %v295_v42 = vpop.f32.mrb[0].mxu1 }
 0x1f8   :  { %v296_v43 = vadd.f32 %v295_v42, %v174_v40  ;;  %v297_v44 = vpop.f32.mrb[1].mxu1 }
 0x1f9   :  { %v298_v45 = vadd.f32 %v297_v44, %v178_v41  ;;  %v299_v46 = vpop.f32.mrb[2].mxu1 }
 0x1fa   :  { %v304_v47 = vmax.f32 %v296_v43, 0.0  ;;  %v300_v48 = vadd.f32 %v299_v46, %v174_v40  ;;  %v301_v49 = vpop.f32.mrb[3].mxu1 }
 0x1fb   :  { %v305_v50 = vmax.f32 %v298_v45, 0.0  ;;  %v302_v51 = vadd.f32 %v301_v49, %v178_v41 }
 0x1fc   :  { %v306_v52 = vmax.f32 %v300_v48, 0.0 }
 0x1fd   :  { %v364_v53 = vpack.c.bf16 %v305_v50, %v304_v47  ;;  %v307_v54 = vmax.f32 %v302_v51, 0.0 }
 0x1ff   :  { %320 = vst [vmem:[#allocation8] sm:$0xff] %v364_v53  ;;  %v365_v55 = vpack.c.bf16 %v307_v54, %v306_v52 }
 0x201   :  { %321 = vst [vmem:[#allocation8 + $0x8] sm:$0xff] %v365_v55 }
 0x202   :  { %499 = shalt.err (!%p496_p0)
}
 0x203   :  { %s500_s12 = scalar_lea.hbm %s625_s5, 256 }
 0x204   :  { %p501_p1 = scmp.ne.s32.totalorder %s625_s5, %s500_s12  ;;  %p504_p2 = scmp.lt.u32.totalorder %s500_s12, %s625_s5 }
 0x206   :  { %p506_p3 = pnand %p504_p2, %p501_p1 }
 0x208   :  { %509 = shalt.err (!%p506_p3)
}
 0x209   :  { %333 = dma.vmem_to_hbm [thread:$0]  %s328_s9, 256, %s625_s5, [#allocation4], %s520_s1, %s520_s1, %s521_s17  }
 0x20a   :  { %514 = dma.done.wait [#allocation4], 256  }
 0x20b   :  { %515 = vsyncadd [#allocation4], 4294967040 }
 0x20c   :  { %337 = vsyncpa [#allocation3], 1 }
 0x20d   :  { %338 = vsyncpa [#allocation6], 1 }
 0x20e   :  { %339 = vsyncpa [#allocation4], 1 }

</bundles_post_ra>
